<compile_context>
chip_gen: v7x
topology: tpu7x:2x2x1
jax: 0.10.0
libtpu: 0.0.40
codegen_flags: <defaults>
</compile_context>

<pallas_src>
import math

import jax
import jax.numpy as jnp
from jax import lax
from jax.experimental import pallas as pl
from jax.experimental.pallas import tpu as pltpu

N_EMBED = 384       # matches module's n_embed
BLOCK_SIZE = 256    # matches module's block_size (max T)


def head_kernel(x_ref, wqkv_ref, o_ref):
    """One grid step == a block of batch elements. Fused QKV projection,
    scaled scores, causal mask, softmax and weighted sum all run in-kernel."""
    Bblk, T, C = x_ref.shape
    H = o_ref.shape[-1]

    # ---- fused QKV projection: one (Bblk*T, C) @ (C, 3H) MXU matmul (bf16 in, f32 acc)
    x2d = x_ref[...].reshape(Bblk * T, C).astype(jnp.bfloat16)
    qkv = jnp.dot(x2d, wqkv_ref[...], preferred_element_type=jnp.float32)  # (Bblk*T, 3H)

    # 1/sqrt(C) scale is pre-folded into the query weight columns (wrapper).
    q = qkv[:, 0 * H:1 * H].reshape(Bblk, T, H).astype(jnp.bfloat16)
    k = qkv[:, 1 * H:2 * H].reshape(Bblk, T, H).astype(jnp.bfloat16)
    v = qkv[:, 2 * H:3 * H].reshape(Bblk, T, H).astype(jnp.bfloat16)

    # ---- scores: contract the head axis directly (no explicit k.T materialization)
    scores = jnp.einsum('bqh,bkh->bqk', q, k,
                        preferred_element_type=jnp.float32)                # (Bblk, T, T)

    # ---- causal mask (tril == 0 -> -inf), broadcast over the batch block
    row = lax.broadcasted_iota(jnp.int32, (T, T), 0)
    col = lax.broadcasted_iota(jnp.int32, (T, T), 1)
    scores = jnp.where(col <= row, scores, -jnp.inf)

    # ---- softmax along last axis, in f32 (exp + approx reciprocal -> EUP slot)
    scores = scores - jnp.max(scores, axis=-1, keepdims=True)
    p = jnp.exp(scores)
    p = p * pl.reciprocal(jnp.sum(p, axis=-1, keepdims=True), approx=True)

    # TODO(synk): nn.Dropout(0.2) omitted — identity in eval/inference mode.

    out = jnp.einsum('bqk,bkh->bqh', p.astype(jnp.bfloat16), v,
                     preferred_element_type=jnp.float32)                   # (Bblk, T, H)
    # TODO(synk): H=64 output forces masked stores; fuse >=2 heads per kernel
    # for a lane-dense (>=128) output slab when used inside multi-head attention.
    o_ref[...] = out.astype(o_ref.dtype)


def _pick_batch_block(B, max_bblk=8):
    """Largest divisor of B <= max_bblk that still leaves >= 2 grid steps
    (keeps both v7x TensorCores busy while amortizing per-step overhead)."""
    if B <= 1:
        return 1
    best = 1
    for d in range(1, min(B, max_bblk) + 1):
        if B % d == 0 and B // d >= 2:
            best = d
    return best


def head_forward(x, w_key, w_query, w_value):
    """x: (B, T, C); w_*: (H, C) PyTorch nn.Linear weights (no bias)."""
    B, T, C = x.shape
    H = w_key.shape[0]
    assert C == N_EMBED and T <= BLOCK_SIZE

    # Fuse [query | key | value] into one (C, 3H) matrix. The module scales
    # scores by 1/sqrt(C) (= n_embed, not head_size — intentional, matches the
    # PyTorch code); folding it into the query columns is mathematically
    # identical and removes the in-kernel scale entirely. Cast to bf16 for the
    # MXU; accumulation is f32 inside the kernel.
    scale = 1.0 / math.sqrt(C)
    w_qkv = jnp.concatenate(
        [jnp.asarray(w_query, jnp.float32).T * scale,   # (C, H)
         jnp.asarray(w_key, jnp.float32).T,             # (C, H)
         jnp.asarray(w_value, jnp.float32).T],          # (C, H)
        axis=1).astype(jnp.bfloat16)                    # (C, 3H)

    bblk = _pick_batch_block(B)
    grid = (B // bblk,)

    return pl.pallas_call(
        head_kernel,
        out_shape=jax.ShapeDtypeStruct((B, T, H), x.dtype),
        grid_spec=pltpu.PrefetchScalarGridSpec(
            num_scalar_prefetch=0,
            grid=grid,
            in_specs=[
                pl.BlockSpec((bblk, T, C), lambda b: (b, 0, 0)),
                pl.BlockSpec((C, 3 * H), lambda b: (0, 0)),
            ],
            out_specs=pl.BlockSpec((bblk, T, H), lambda b: (b, 0, 0)),
        ),
        compiler_params=pltpu.CompilerParams(
            dimension_semantics=("parallel",)),
    )(x, w_qkv)


def head_reference(x, w_key, w_query, w_value):
    """Pure-JAX f32 reference mirroring the PyTorch forward (eval mode)."""
    B, T, C = x.shape
    k = x @ w_key.T
    q = x @ w_query.T
    v = x @ w_value.T
    w = (q @ jnp.swapaxes(k, -2, -1)) / math.sqrt(C)
    tril = jnp.tril(jnp.ones((T, T), jnp.float32))
    w = jnp.where(tril == 0, -jnp.inf, w)
    w = jax.nn.softmax(w, axis=-1)
    return w @ v


if __name__ == "__main__":
    B, T, C, H = 2, 128, N_EMBED, 64

    key = jax.random.PRNGKey(0)
    kx, kk, kq, kv = jax.random.split(key, 4)

    x = jax.random.normal(kx, (B, T, C), dtype=jnp.float32)

    # Deterministic init matching nn.Linear default: U(-1/sqrt(fan_in), 1/sqrt(fan_in))
    bound = 1.0 / math.sqrt(C)
    w_key = jax.random.uniform(kk, (H, C), jnp.float32, -bound, bound)
    w_query = jax.random.uniform(kq, (H, C), jnp.float32, -bound, bound)
    w_value = jax.random.uniform(kv, (H, C), jnp.float32, -bound, bound)

    out = head_forward(x, w_key, w_query, w_value)
    out = jax.block_until_ready(out)

    ref = head_reference(x, w_key, w_query, w_value)
    assert out.shape == (B, T, H)
    # bf16 MXU inputs (f32 accumulation) -> loosened tolerance vs. the f32 reference.
    assert jnp.allclose(out, ref, atol=5e-2, rtol=5e-2), "mismatch vs reference"

    print("KERNEL_OK")
</pallas_src>

<mosaic_0001>
module attributes {stable_mosaic.version = 11 : i64} {
  func.func @head_kernel(%arg0: i32, %arg1: memref<1x128x384xf32, #tpu.memory_space<vmem>>, %arg2: memref<384x192xbf16, #tpu.memory_space<vmem>>, %arg3: memref<1x128x64xf32, #tpu.memory_space<vmem>>) attributes {dimension_semantics = [#tpu.dimension_semantics<parallel>], iteration_bounds = array<i64: 2>, scalar_prefetch = 0 : i64, scratch_operands = 0 : i64, tpu.core_type = #tpu.core_type<tc>, window_params = [{transform_indices = @transform_0, window_bounds = array<i64: 1, 128, 384>}, {pipeline_mode = #tpu.pipeline_mode<synchronous>, transform_indices = @transform_1, window_bounds = array<i64: 384, 192>}, {transform_indices = @transform_2, window_bounds = array<i64: 1, 128, 64>}]} {
    %c0 = arith.constant 0 : index
    %c0_0 = arith.constant 0 : index
    %c0_1 = arith.constant 0 : index
    %0 = vector.load %arg1[%c0, %c0_0, %c0_1] : memref<1x128x384xf32, #tpu.memory_space<vmem>>, vector<1x128x384xf32>
    %1 = vector.shape_cast %0 : vector<1x128x384xf32> to vector<128x384xf32>
    %2 = arith.truncf %1 : vector<128x384xf32> to vector<128x384xbf16>
    %c0_2 = arith.constant 0 : index
    %c0_3 = arith.constant 0 : index
    %3 = vector.load %arg2[%c0_2, %c0_3] : memref<384x192xbf16, #tpu.memory_space<vmem>>, vector<384x192xbf16>
    %cst = arith.constant dense<0.000000e+00> : vector<128x192xf32>
    %4 = tpu.matmul %2, %3, %cst {dimension_numbers = #tpu.dot_dimension_numbers<[1], [0], [0], [1], [0, 0, 1, 1], [], []>} : vector<128x384xbf16>, vector<384x192xbf16>, vector<128x192xf32> -> vector<128x192xf32>
    %5 = vector.extract_strided_slice %4 {offsets = [0, 0], sizes = [128, 64], strides = [1, 1]} : vector<128x192xf32> to vector<128x64xf32>
    %6 = vector.shape_cast %5 : vector<128x64xf32> to vector<1x128x64xf32>
    %7 = arith.truncf %6 : vector<1x128x64xf32> to vector<1x128x64xbf16>
    %8 = vector.extract_strided_slice %4 {offsets = [0, 64], sizes = [128, 64], strides = [1, 1]} : vector<128x192xf32> to vector<128x64xf32>
    %9 = vector.shape_cast %8 : vector<128x64xf32> to vector<1x128x64xf32>
    %10 = arith.truncf %9 : vector<1x128x64xf32> to vector<1x128x64xbf16>
    %11 = vector.extract_strided_slice %4 {offsets = [0, 128], sizes = [128, 64], strides = [1, 1]} : vector<128x192xf32> to vector<128x64xf32>
    %12 = vector.shape_cast %11 : vector<128x64xf32> to vector<1x128x64xf32>
    %13 = arith.truncf %12 : vector<1x128x64xf32> to vector<1x128x64xbf16>
    "tpu.trace_start"() <{level = 10 : i32, message = "bqh,bkh->bqk"}> : () -> ()
    %cst_4 = arith.constant dense<0.000000e+00> : vector<1x128x128xf32>
    %14 = tpu.matmul %7, %10, %cst_4 {dimension_numbers = #tpu.dot_dimension_numbers<[2], [2], [1], [1], [0, 0, 0, 1, 1, 1], [0], [0]>} : vector<1x128x64xbf16>, vector<1x128x64xbf16>, vector<1x128x128xf32> -> vector<1x128x128xf32>
    "tpu.trace_stop"() : () -> ()
    %15 = tpu.iota {dimensions = array<i32: 0>} : vector<128x128xi32>
    %16 = tpu.iota {dimensions = array<i32: 1>} : vector<128x128xi32>
    %17 = arith.cmpi sle, %16, %15 : vector<128x128xi32>
    %cst_5 = arith.constant 0xFF800000 : f32
    %18 = vector.shape_cast %17 : vector<128x128xi1> to vector<1x128x128xi1>
    %19 = vector.broadcast %cst_5 : f32 to vector<1x128x128xf32>
    %20 = arith.select %18, %14, %19 : vector<1x128x128xi1>, vector<1x128x128xf32>
    %cst_6 = arith.constant dense<0xFF800000> : vector<1x128xf32>
    %21 = vector.multi_reduction <maximumf>, %20, %cst_6 [2] : vector<1x128x128xf32> to vector<1x128xf32>
    %22 = vector.shape_cast %21 : vector<1x128xf32> to vector<1x128x1xf32>
    %23 = vector.broadcast %22 : vector<1x128x1xf32> to vector<1x128x128xf32>
    %24 = arith.subf %20, %23 : vector<1x128x128xf32>
    %25 = math.exp %24 : vector<1x128x128xf32>
    %cst_7 = arith.constant dense<0.000000e+00> : vector<1x128xf32>
    %26 = vector.multi_reduction <add>, %25, %cst_7 [2] : vector<1x128x128xf32> to vector<1x128xf32>
    %27 = vector.shape_cast %26 : vector<1x128xf32> to vector<1x128x1xf32>
    %28 = tpu.reciprocal %27 {approx = true} : vector<1x128x1xf32> -> vector<1x128x1xf32>
    %29 = vector.broadcast %28 : vector<1x128x1xf32> to vector<1x128x128xf32>
    %30 = arith.mulf %25, %29 : vector<1x128x128xf32>
    %31 = arith.truncf %30 : vector<1x128x128xf32> to vector<1x128x128xbf16>
    "tpu.trace_start"() <{level = 10 : i32, message = "bqk,bkh->bqh"}> : () -> ()
    %cst_8 = arith.constant dense<0.000000e+00> : vector<1x128x64xf32>
    %32 = tpu.matmul %31, %13, %cst_8 {dimension_numbers = #tpu.dot_dimension_numbers<[2], [1], [1], [2], [0, 0, 0, 1, 1, 2], [0], [0]>} : vector<1x128x128xbf16>, vector<1x128x64xbf16>, vector<1x128x64xf32> -> vector<1x128x64xf32>
    "tpu.trace_stop"() : () -> ()
    %c0_9 = arith.constant 0 : index
    %c0_10 = arith.constant 0 : index
    %c0_11 = arith.constant 0 : index
    %33 = vector.load %arg3[%c0_9, %c0_10, %c0_11] : memref<1x128x64xf32, #tpu.memory_space<vmem>>, vector<1x128x64xf32>
    tpu.vector_store %arg3[%c0_9, %c0_10, %c0_11], %32 {strides = array<i32>} : memref<1x128x64xf32, #tpu.memory_space<vmem>>, vector<1x128x64xf32>,
    return
  }
  func.func @transform_0(%arg0: i32) -> (i32, i32, i32) {
    %c0_i32 = arith.constant 0 : i32
    %c0_i32_0 = arith.constant 0 : i32
    %c0_i32_1 = arith.constant 0 : i32
    return %arg0, %c0_i32, %c0_i32_0 : i32, i32, i32
  }
  func.func @transform_1(%arg0: i32) -> (i32, i32) {
    %c0_i32 = arith.constant 0 : i32
    %c0_i32_0 = arith.constant 0 : i32
    %c0_i32_1 = arith.constant 0 : i32
    return %c0_i32, %c0_i32_0 : i32, i32
  }
  func.func @transform_2(%arg0: i32) -> (i32, i32, i32) {
    %c0_i32 = arith.constant 0 : i32
    %c0_i32_0 = arith.constant 0 : i32
    %c0_i32_1 = arith.constant 0 : i32
    return %arg0, %c0_i32, %c0_i32_0 : i32, i32, i32
  }
}

</mosaic_0001>

<bundles_post_ra>
// kernel: tpu_custom_call.1
= control target key start
LH: loop header
LB: loop body
LE: loop exit
PB: predicated region body
PF: predicated region fallthrough
CT: control target
= control target key end

     0   :  { %7 = vsyncpa [#allocation3], 0  ;;  %s2412_s0 = inlined_call_operand.hbm [shape: f32[2,128,384], index: 0, kind: input, shape index: {}]   ;;  %s2413_s1 = inlined_call_operand.vmem [shape: bf16[384,192], index: 1, kind: input, shape index: {}]   ;;  %s2414_s2 = inlined_call_operand.vmem [shape: f32[2,128,64], index: 2, kind: output, shape index: {}]  }
   0x1   :  { %9 = vsyncpa [#allocation3 + $0x1], 0  ;;  %s1806_s9 = smov 0   ;;  %s1808_s10 = smov 0  }
   0x2   :  { %s1810_s11 = smov 0   ;;  %s1812_s12 = smov 0  }
   0x3 LB: > { %s1825_s13 = sadd.s32 4294967295, %s1784_s12   ;;  %s1828_s14 = sadd.s32 1, %s1784_s12   ;;  %s1784_s12 = sphi %s1812_s12, %s2421_s12   ;;  %s1780_s11 = sphi %s1810_s11, %s2420_s11   ;;  %s1776_s10 = sphi %s1808_s10, %s2419_s10   ;;  %s1772_s9 = sphi %s1806_s9, %s2418_s9  }
   0x4   : > { %s19_s15 = ssub.s32 %s1784_s12, %s1828_s14  ;;  %s22_s16 = sadd.s32 1, %s1780_s11 }
   0x5   : > { %p20_p0 = scmp.eq.s32.totalorder %s19_s15, 0  ;;  %p29_p1 = scmp.ne.s32.totalorder %s1780_s11, %s1776_s10 }
   0x6   : > { %p30_p2 = scmp.eq.s32.totalorder %s1784_s12, 0  ;;  %p35_p3 = scmp.ne.s32.totalorder %s1776_s10, %s1772_s9 }
   0x7   : > { %s1838_s17 = scalar_select %p20_p0, %s1780_s11, %s22_s16  }
   0x8   : > { %p31_p4 = por %p30_p2, %p29_p1  ;;  %p36_p5 = scmp.eq.s32.totalorder %s1825_s13, 0 }
   0x9   : > { %p1547_p6 = scmp.lt.s32.totalorder %s1784_s12, 2  ;;  %s109_s19 = sand.u32 1, %s1780_s11  }
   0xa   : > { %p1842_p7 = por %p36_p5, %p35_p3  ;;  %s1538_s20 = smul.u32 384, %s109_s19 }
   0xb   : > { %s1539_s21 = smul.u32 6144, %s1784_s12  ;;  %p1848_p8 = pnand %p1547_p6, %p31_p4 }
   0xc   : > { %s113_s26 = scalar_lea.vmem [#allocation2], %s1538_s20  ;;  %s1860_s28 = scalar_lea.sflag [#allocation3], %s109_s19 }
   0xd   : > { %s1855_s25 = scalar_lea.hbm %s2412_s0, %s1539_s21  ;;  %s120_s27 = sshll.u32 %s113_s26, 4  ;;  %s1857_s27 = int_to_ptr.vmem [resolvable:$true] %s120_s27 }
   0xe   : > { %s1720_s29 = scalar_lea.hbm %s1855_s25, 6144  ;;  %p1722_p11 = pneg %p1848_p8 }
   0xf   : > { %p1721_p10 = scmp.ne.s32.totalorder %s1855_s25, %s1720_s29  ;;  %s1725_s4 = scalar_lea.hbm %s2412_s0, 12288 }
  0x10   : > { %p1726_p0 = scmp.lt.u32.totalorder %s1855_s25, %s2412_s0  ;;  %p1727_p1 = scmp.lt.u32.totalorder %s1725_s4, %s1720_s29 }
  0x11   : > { %p1723_p12 = pnand %p1722_p11, %p1721_p10  ;;  %p1729_p3 = scmp.lt.u32.totalorder %s1720_s29, %s1855_s25 }
  0x12   : > { %p1728_p2 = por %p1727_p1, %p1726_p0 }
  0x13   : > { %p1724_p13 = pneg %p1723_p12 }
  0x14   : > { %p1730_p4 = por %p1729_p3, %p1728_p2 }
  0x16   : > { %p1731_p5 = pnand %p1730_p4, %p1724_p13 }
  0x18   : > { %1734 = shalt.err (!%p1731_p5)
}
  0x19   : > { %s1735_s7 = scalar_lea.vmem %s1857_s27, 6144  ;;  %s1786_s8 = smov [#allocation2]  }
  0x1a   : > { %p1736_p6 = scmp.ne.s32.totalorder %s1857_s27, %s1735_s7  ;;  %s1740_s9 = sshll.u32 %s1786_s8, 4  ;;  %s1741_s9 = int_to_ptr.vmem [resolvable:$false] %s1740_s9 }
  0x1b   : > { %s1742_s15 = scalar_lea.vmem %s1741_s9, 12288  ;;  %p1743_p9 = scmp.lt.s32.totalorder %s1857_s27, %s1741_s9 }
  0x1c   : > { %p1738_p10 = pnand %p1736_p6, %p1722_p11  ;;  %p1744_p0 = scmp.lt.s32.totalorder %s1742_s15, %s1735_s7 }
  0x1e   : > { %p1739_p12 = pneg %p1738_p10  ;;  %p1745_p1 = por %p1744_p0, %p1743_p9 }
  0x20   : > { %p1746_p2 = pnand %p1745_p1, %p1739_p12 }
  0x22   : > { %1749 = shalt.err (!%p1746_p2)
}
  0x23   : > { %s1787_s16 = smov 384   ;;  %s1788_s19 = smov 24  }
  0x24   : > { %1546 = dma.hbm_to_vmem [thread:$0]  (!%p1848_p8), %s1855_s25, 6144, %s1857_s27, %s1860_s28, %s1787_s16, %s1787_s16, %s1788_s19  }
  0x25   : > { %p128_p11 = scmp.lt.s32.totalorder %s1784_s12, 3  ;;  %p2417_p13 = scmp.ge.s32.totalorder %s1784_s12, 1 }
  0x27   : > { %p129_p3 = pnand %p2417_p13, %p128_p11 }
  0x28   : > { %s134_s20 = sand.u32 (!%p129_p3), 1, %s1776_s10  }
  0x29   : > { %132 = sbr.rel (%p129_p3) target bundleno = 1291 (0x50b), region = 28  ;;  %s135_s23 = scalar_lea.sflag (!%p129_p3), [#allocation3], %s134_s20 }
  0x2a   : > { %s1540_s21 = smul.u32 (!%p129_p3), 384, %s134_s20 }
  0x2c   : > { %s1892_s24 = scalar_lea.vmem (!%p129_p3), [#allocation2], %s1540_s21 }
  0x30   : > { %1767 = dma.done.wait (%p1842_p7), %s135_s23, 6144  }
  0x31   : > { %1769 = vsyncadd (%p1842_p7), %s135_s23, 4294961152  ;;  %v1789_v0 = vmov 0   ;;  %v1584_v1 = vld [vmem:[%s2413_s1 + $0x4] ss:$8 sps:$4 sm:$0xff]   ;;  %v1586_v2 = vld [vmem:[%s2413_s1] ss:$8 sps:$4 sm:$0xff]  }
  0x32   : > { %670 = vmatprep.mubr.bf16.mxu1 %v1789_v0  ;;  %525 = vmatprep.subr.bf16.mxu0 %v1584_v1  ;;  %v1587_v3 = vld [vmem:[%s2413_s1 + $0x14] ss:$8 sps:$4 sm:$0xff]   ;;  %v1589_v4 = vld [vmem:[%s2413_s1 + $0x10] ss:$8 sps:$4 sm:$0xff]   ;;  %v1590_v5 = vld [vmem:[%s2413_s1 + $0x24] ss:$8 sps:$4 sm:$0xff]  }
  0x33   : > { %526 = vmatpush1.bf16.msra.mxu0 %v1586_v2  ;;  %v1592_v6 = vld [vmem:[%s2413_s1 + $0x20] ss:$8 sps:$4 sm:$0xff]   ;;  %v1593_v7 = vld [vmem:[%s2413_s1 + $0x34] ss:$8 sps:$4 sm:$0xff]   ;;  %v1595_v8 = vld [vmem:[%s2413_s1 + $0x30] ss:$8 sps:$4 sm:$0xff]  }
  0x34   : > { %527 = vmatprep.subr.bf16.mxu0 %v1587_v3  ;;  %v1608_v9 = vld [vmem:[%s2413_s1 + $0x104] ss:$8 sps:$4 sm:$0xff]   ;;  %v1610_v10 = vld [vmem:[%s2413_s1 + $0x100] ss:$8 sps:$4 sm:$0xff]   ;;  %v1614_v12 = vld [vmem:[%s2413_s1 + $0x114] ss:$8 sps:$4 sm:$0xff]  }
  0x35   : > { %v1596_v11 = vld [vmem:[%s2413_s1 + $0x44] ss:$8 sps:$4 sm:$0xff]   ;;  %638 = vmatprep.subr.bf16.mxu1 %v1608_v9  ;;  %v1616_v13 = vld [vmem:[%s2413_s1 + $0x110] ss:$8 sps:$4 sm:$0xff]   ;;  %v1598_v14 = vld [vmem:[%s2413_s1 + $0x40] ss:$8 sps:$4 sm:$0xff]  }
  0x36   : > { %639 = vmatpush1.bf16.msra.mxu1 %v1610_v10  ;;  %v1599_v15 = vld [vmem:[%s2413_s1 + $0x54] ss:$8 sps:$4 sm:$0xff]   ;;  %v1620_v16 = vld [vmem:[%s2413_s1 + $0x124] ss:$8 sps:$4 sm:$0xff]   ;;  %v1622_v17 = vld [vmem:[%s2413_s1 + $0x120] ss:$8 sps:$4 sm:$0xff]  }
  0x37   : > { %528 = vmatpush1.bf16.msra.mxu0 %v1589_v4  ;;  %640 = vmatprep.subr.bf16.mxu1 %v1614_v12  ;;  %v1601_v18 = vld [vmem:[%s2413_s1 + $0x50] ss:$8 sps:$4 sm:$0xff]   ;;  %v1626_v19 = vld [vmem:[%s2413_s1 + $0x134] ss:$8 sps:$4 sm:$0xff]   ;;  %v1602_v20 = vld [vmem:[%s2413_s1 + $0x64] ss:$8 sps:$4 sm:$0xff]  }
  0x38   : > { %529 = vmatprep.subr.bf16.mxu0 %v1590_v5  ;;  %v1628_v21 = vld [vmem:[%s2413_s1 + $0x130] ss:$8 sps:$4 sm:$0xff]   ;;  %v1604_v22 = vld [vmem:[%s2413_s1 + $0x60] ss:$8 sps:$4 sm:$0xff]   ;;  %v1632_v23 = vld [vmem:[%s2413_s1 + $0x144] ss:$8 sps:$4 sm:$0xff]  }
  0x39   : > { %v1605_v24 = vld [vmem:[%s2413_s1 + $0x74] ss:$8 sps:$4 sm:$0xff]   ;;  %v1634_v25 = vld [vmem:[%s2413_s1 + $0x140] ss:$8 sps:$4 sm:$0xff]   ;;  %v1607_v26 = vld [vmem:[%s2413_s1 + $0x70] ss:$8 sps:$4 sm:$0xff]  }
  0x3a   : > { %641 = vmatpush1.bf16.msra.mxu1 %v1616_v13  ;;  %v1638_v27 = vld [vmem:[%s2413_s1 + $0x154] ss:$8 sps:$4 sm:$0xff]   ;;  %v1611_v28 = vld [vmem:[%s2413_s1 + $0x84] ss:$8 sps:$4 sm:$0xff]   ;;  %v1640_v29 = vld [vmem:[%s2413_s1 + $0x150] ss:$8 sps:$4 sm:$0xff]  }
  0x3b   : > { %530 = vmatpush1.bf16.msra.mxu0 %v1592_v6  ;;  %642 = vmatprep.subr.bf16.mxu1 %v1620_v16  ;;  %v1613_v30 = vld [vmem:[%s2413_s1 + $0x80] ss:$8 sps:$4 sm:$0xff]   ;;  %v1644_v31 = vld [vmem:[%s2413_s1 + $0x164] ss:$8 sps:$4 sm:$0xff]   ;;  %v1617_v32 = vld [vmem:[%s2413_s1 + $0x94] ss:$8 sps:$4 sm:$0xff]  }
  0x3c   : > { %531 = vmatprep.subr.bf16.mxu0 %v1593_v7  ;;  %v166_v33 = vld [vmem:[%s1892_s24 + $0x8] sm:$0xff]  ;;  %v169_v34 = vld [vmem:[%s1892_s24 + $0x20] sm:$0xff]  ;;  %v1619_v37 = vld [vmem:[%s2413_s1 + $0x90] ss:$8 sps:$4 sm:$0xff]   ;;  %vm791_vm0 = vcmask 523264   ;;  %p159_p7 = scmp.lt.s32.totalorder %s1825_s13, 1 }
  0x3d   : > { %v1646_v35 = vld [vmem:[%s2413_s1 + $0x160] ss:$8 sps:$4 sm:$0xff]   ;;  %v214_v36 = vpack.c.bf16 %v169_v34, %v166_v33  ;;  %v1650_v38 = vld [vmem:[%s2413_s1 + $0x174] ss:$8 sps:$4 sm:$0xff]   ;;  %v1623_v39 = vld [vmem:[%s2413_s1 + $0xa4] ss:$8 sps:$4 sm:$0xff]  }
  0x3e   : > { %643 = vmatpush1.bf16.msra.mxu1 %v1622_v17  ;;  %v1652_v40 = vld [vmem:[%s2413_s1 + $0x170] ss:$8 sps:$4 sm:$0xff]   ;;  %v170_v42 = vld [vmem:[%s1892_s24 + $0x28] sm:$0xff]  ;;  %v1629_v44 = vld [vmem:[%s2413_s1 + $0xb4] ss:$8 sps:$4 sm:$0xff]   ;;  %s2423_s13 = smov (!%p159_p7, %s1825_s13), 1 }
  0x3f   : > { %532 = vmatpush1.bf16.msra.mxu0 %v1595_v8  ;;  %644 = vmatprep.subr.bf16.mxu1 %v1626_v19  ;;  %v167_v41 = vld [vmem:[%s1892_s24 + $0x10] sm:$0xff]  ;;  %v1625_v43 = vld [vmem:[%s2413_s1 + $0xa0] ss:$8 sps:$4 sm:$0xff]   ;;  %v1635_v47 = vld [vmem:[%s2413_s1 + $0xc4] ss:$8 sps:$4 sm:$0xff]   ;;  %s1385_s30 = sshll.u32 %s2423_s13, 7 }
  0x40   : > { %533 = vmatprep.subr.bf16.mxu0 %v1596_v11  ;;  %557 = vmatprep.mubr.bf16.mxu0 %v214_v36  ;;  %v215_v45 = vpack.c.bf16 %v170_v42, %v167_v41  ;;  %v1631_v46 = vld [vmem:[%s2413_s1 + $0xb0] ss:$8 sps:$4 sm:$0xff]   ;;  %v173_v48 = vld [vmem:[%s1892_s24 + $0x40] sm:$0xff]  ;;  %v1641_v51 = vld [vmem:[%s2413_s1 + $0xd4] ss:$8 sps:$4 sm:$0xff]   ;;  %s2365_s5 = scalar_lea.vmem %s2414_s2, %s1385_s30 }
  0x41   : > { %v176_v49 = vld [vmem:[%s1892_s24 + $0x58] sm:$0xff]  ;;  %v1637_v50 = vld [vmem:[%s2413_s1 + $0xc0] ss:$8 sps:$4 sm:$0xff]   ;;  %v1647_v54 = vld [vmem:[%s2413_s1 + $0xe4] ss:$8 sps:$4 sm:$0xff]  }
  0x42   : > { %645 = vmatpush1.bf16.msra.mxu1 %v1628_v21  ;;  %v218_v52 = vpack.c.bf16 %v176_v49, %v173_v48  ;;  %v1643_v53 = vld [vmem:[%s2413_s1 + $0xd0] ss:$8 sps:$4 sm:$0xff]   ;;  %v182_v56 = vld [vmem:[%s1892_s24 + $0x88] sm:$0xff]  ;;  %v1653_v58 = vld [vmem:[%s2413_s1 + $0xf4] ss:$8 sps:$4 sm:$0xff]  }
  0x43   : > { %534 = vmatpush1.bf16.msra.mxu0 %v1598_v14  ;;  %646 = vmatprep.subr.bf16.mxu1 %v1632_v23  ;;  %v179_v55 = vld [vmem:[%s1892_s24 + $0x70] sm:$0xff]  ;;  %v1649_v57 = vld [vmem:[%s2413_s1 + $0xe0] ss:$8 sps:$4 sm:$0xff]   ;;  %v168_v62 = vld [vmem:[%s1892_s24 + $0x18] sm:$0xff] }
  0x44   : > { %535 = vmatprep.subr.bf16.mxu0 %v1599_v15  ;;  %v221_v59 = vpack.c.bf16 %v182_v56, %v179_v55  ;;  %v1655_v60 = vld [vmem:[%s2413_s1 + $0xf0] ss:$8 sps:$4 sm:$0xff]   ;;  %v165_v61 = vld [vmem:[%s1892_s24] sm:$0xff]  ;;  %v174_v8 = vld [vmem:[%s1892_s24 + $0x48] sm:$0xff] }
  0x45   : > { %v172_v63 = vld [vmem:[%s1892_s24 + $0x38] sm:$0xff]  ;;  %v175_v1 = vld [vmem:[%s1892_s24 + $0x50] sm:$0xff]  ;;  %v213_v2 = vpack.c.bf16 %v168_v62, %v165_v61  ;;  %v185_v3 = vld [vmem:[%s1892_s24 + $0xa0] sm:$0xff] }
  0x46   : > { %647 = vmatpush1.bf16.msra.mxu1 %v1634_v25  ;;  %v188_v4 = vld [vmem:[%s1892_s24 + $0xb8] sm:$0xff]  ;;  %v217_v5 = vpack.c.bf16 %v175_v1, %v172_v63  ;;  %v171_v7 = vld [vmem:[%s1892_s24 + $0x30] sm:$0xff]  ;;  %v178_v9 = vld [vmem:[%s1892_s24 + $0x68] sm:$0xff] }
  0x47   : > { %536 = vmatpush1.bf16.msra.mxu0 %v1601_v18  ;;  %648 = vmatprep.subr.bf16.mxu1 %v1638_v27  ;;  %v224_v6 = vpack.c.bf16 %v188_v4, %v185_v3  ;;  %v181_v10 = vld [vmem:[%s1892_s24 + $0x80] sm:$0xff]  ;;  %v216_v11 = vpack.c.bf16 %v174_v8, %v171_v7  ;;  %v191_v12 = vld [vmem:[%s1892_s24 + $0xd0] sm:$0xff]  ;;  %v194_v13 = vld [vmem:[%s1892_s24 + $0xe8] sm:$0xff] }
  0x48   : > { %537 = vmatprep.subr.bf16.mxu0 %v1602_v20  ;;  %v220_v14 = vpack.c.bf16 %v181_v10, %v178_v9  ;;  %v227_v15 = vpack.c.bf16 %v194_v13, %v191_v12  ;;  %v177_v16 = vld [vmem:[%s1892_s24 + $0x60] sm:$0xff]  ;;  %v180_v17 = vld [vmem:[%s1892_s24 + $0x78] sm:$0xff]  ;;  %v187_v19 = vld [vmem:[%s1892_s24 + $0xb0] sm:$0xff] }
  0x49   : > { %v184_v18 = vld [vmem:[%s1892_s24 + $0x98] sm:$0xff]  ;;  %v219_v20 = vpack.c.bf16 %v180_v17, %v177_v16  ;;  %v197_v21 = vld [vmem:[%s1892_s24 + $0x100] sm:$0xff]  ;;  %v183_v25 = vld [vmem:[%s1892_s24 + $0x90] sm:$0xff] }
  0x4a   : > { %649 = vmatpush1.bf16.msra.mxu1 %v1640_v29  ;;  %v223_v23 = vpack.c.bf16 %v187_v19, %v184_v18  ;;  %v190_v27 = vld [vmem:[%s1892_s24 + $0xc8] sm:$0xff]  ;;  %v189_v34 = vld [vmem:[%s1892_s24 + $0xc0] sm:$0xff]  ;;  %v196_v36 = vld [vmem:[%s1892_s24 + $0xf8] sm:$0xff] }
  0x4b   : > { %538 = vmatpush1.bf16.msra.mxu0 %v1604_v22  ;;  %650 = vmatprep.subr.bf16.mxu1 %v1644_v31  ;;  %v200_v22 = vld [vmem:[%s1892_s24 + $0x118] sm:$0xff]  ;;  %v206_v31 = vld [vmem:[%s1892_s24 + $0x148] sm:$0xff] }
  0x4c   : > { %539 = vmatprep.subr.bf16.mxu0 %v1605_v24  ;;  %v230_v24 = vpack.c.bf16 %v200_v22, %v197_v21  ;;  %v204_v49 = vld [vmem:[%s1892_s24 + $0x138] sm:$0xff]  ;;  %v210_v55 = vld [vmem:[%s1892_s24 + $0x168] sm:$0xff] }
  0x4e   : > { %651 = vmatpush1.bf16.msra.mxu1 %v1646_v35  ;;  %v192_v35 = vld [vmem:[%s1892_s24 + $0xd8] sm:$0xff] }
  0x4f   : > { %540 = vmatpush1.bf16.msra.mxu0 %v1607_v26  ;;  %652 = vmatprep.subr.bf16.mxu1 %v1650_v38  ;;  %v186_v26 = vld [vmem:[%s1892_s24 + $0xa8] sm:$0xff]  ;;  %v225_v38 = vpack.c.bf16 %v192_v35, %v189_v34 }
  0x50   : > { %541 = vmatprep.subr.bf16.mxu0 %v1611_v28  ;;  %v193_v28 = vld [vmem:[%s1892_s24 + $0xe0] sm:$0xff]  ;;  %v222_v29 = vpack.c.bf16 %v186_v26, %v183_v25 }
  0x52   : > { %653 = vmatpush1.bf16.msra.mxu1 %v1652_v40  ;;  %v212_v40 = vld [vmem:[%s1892_s24 + $0x178] sm:$0xff] }
  0x53   : > { %542 = vmatpush1.bf16.msra.mxu0 %v1613_v30  ;;  %v203_v30 = vld [vmem:[%s1892_s24 + $0x130] sm:$0xff] }
  0x54   : > { %543 = vmatprep.subr.bf16.mxu0 %v1617_v32  ;;  %v226_v32 = vpack.c.bf16 %v193_v28, %v190_v27  ;;  %v233_v33 = vpack.c.bf16 %v206_v31, %v203_v30 }
  0x55   : > { %671 = vmatmul.mubr.bf16.vlgmr.msra.gmra.mrb[0].mxu1 %v215_v45  ;;  %v202_v45 = vld [vmem:[%s1892_s24 + $0x128] sm:$0xff] }
  0x56   : > { %680 = vmatprep.mubr.bf16.mxu1 %v1789_v0 }
  0x57   : > { %544 = vmatpush1.bf16.msra.mxu0 %v1619_v37  ;;  %v199_v37 = vld [vmem:[%s1892_s24 + $0x110] sm:$0xff] }
  0x58   : > { %545 = vmatprep.subr.bf16.mxu0 %v1623_v39  ;;  %v209_v39 = vld [vmem:[%s1892_s24 + $0x160] sm:$0xff]  ;;  %v229_v41 = vpack.c.bf16 %v199_v37, %v196_v36 }
  0x59   : > { %v236_v42 = vpack.c.bf16 %v212_v40, %v209_v39 }
  0x5b   : > { %546 = vmatpush1.bf16.msra.mxu0 %v1625_v43  ;;  %v195_v43 = vld [vmem:[%s1892_s24 + $0xf0] sm:$0xff] }
  0x5c   : > { %547 = vmatprep.subr.bf16.mxu0 %v1629_v44  ;;  %v198_v44 = vld [vmem:[%s1892_s24 + $0x108] sm:$0xff] }
  0x5d   : > { %681 = vmatmul.mubr.bf16.gmra.mrb[4].mxu1 %v218_v52 }
  0x5e   : > { %690 = vmatprep.mubr.bf16.mxu1 %v1789_v0 }
  0x5f   : > { %548 = vmatpush1.bf16.msra.mxu0 %v1631_v46  ;;  %v205_v46 = vld [vmem:[%s1892_s24 + $0x140] sm:$0xff] }
  0x60   : > { %549 = vmatprep.subr.bf16.mxu0 %v1635_v47  ;;  %v228_v47 = vpack.c.bf16 %v198_v44, %v195_v43  ;;  %v232_v48 = vpack.c.bf16 %v205_v46, %v202_v45 }
  0x63   : > { %550 = vmatpush1.bf16.msra.mxu0 %v1637_v50  ;;  %v208_v50 = vld [vmem:[%s1892_s24 + $0x158] sm:$0xff] }
  0x64   : > { %551 = vmatprep.subr.bf16.mxu0 %v1641_v51  ;;  %v211_v51 = vld [vmem:[%s1892_s24 + $0x170] sm:$0xff] }
  0x65   : > { %691 = vmatmul.mubr.bf16.gmra.mrb[8].mxu1 %v221_v59 }
  0x66   : > { %700 = vmatprep.mubr.bf16.mxu1 %v1789_v0 }
  0x67   : > { %552 = vmatpush1.bf16.msra.mxu0 %v1643_v53  ;;  %v235_v53 = vpack.c.bf16 %v211_v51, %v208_v50 }
  0x68   : > { %553 = vmatprep.subr.bf16.mxu0 %v1647_v54  ;;  %v207_v54 = vld [vmem:[%s1892_s24 + $0x150] sm:$0xff] }
  0x69   : > { %v234_v56 = vpack.c.bf16 %v210_v55, %v207_v54 }
  0x6b   : > { %554 = vmatpush1.bf16.msra.mxu0 %v1649_v57 }
  0x6c   : > { %555 = vmatprep.subr.bf16.mxu0 %v1653_v58 }
  0x6d   : > { %701 = vmatmul.mubr.bf16.gmra.mrb[12].mxu1 %v224_v6 }
  0x6e   : > { %710 = vmatprep.mubr.bf16.mxu1 %v1789_v0 }
  0x6f   : > { %556 = vmatpush1.bf16.msra.mxu0 %v1655_v60 }
  0x72   : > { %558 = vmatmul.mubr.bf16.vlgmr.msra.gmra.mrb[0].mxu0 %v213_v2 }
  0x73   : > { %567 = vmatprep.mubr.bf16.mxu0 %v217_v5 }
  0x75   : > { %711 = vmatmul.mubr.bf16.gmra.mrb[16].mxu1 %v227_v15 }
  0x76   : > { %720 = vmatprep.mubr.bf16.mxu1 %v1789_v0 }
  0x7a   : > { %568 = vmatmul.mubr.bf16.gmra.mrb[4].mxu0 %v216_v11 }
  0x7b   : > { %577 = vmatprep.mubr.bf16.mxu0 %v220_v14 }
  0x7d   : > { %721 = vmatmul.mubr.bf16.gmra.mrb[20].mxu1 %v230_v24 }
  0x7e   : > { %730 = vmatprep.mubr.bf16.mxu1 %v1789_v0 }
  0x82   : > { %578 = vmatmul.mubr.bf16.gmra.mrb[8].mxu0 %v219_v20 }
  0x83   : > { %587 = vmatprep.mubr.bf16.mxu0 %v223_v23 }
  0x85   : > { %731 = vmatmul.mubr.bf16.gmra.mrb[24].mxu1 %v233_v33 }
  0x86   : > { %740 = vmatprep.mubr.bf16.mxu1 %v1789_v0  ;;  %v201_v0 = vld [vmem:[%s1892_s24 + $0x120] sm:$0xff]  ;;  %s1790_s24 = smov 64  }
  0x87   : > { %v231_v52 = vpack.c.bf16 %v204_v49, %v201_v0 }
  0x8a   : > { %588 = vmatmul.mubr.bf16.gmra.mrb[12].mxu0 %v222_v29 }
  0x8b   : > { %597 = vmatprep.mubr.bf16.mxu0 %v226_v32 }
  0x8d   : > { %741 = vmatmul.mubr.bf16.gmra.mrb[28].mxu1 %v236_v42 }
  0x92   : > { %598 = vmatmul.mubr.bf16.gmra.mrb[16].mxu0 %v225_v38 }
  0x93   : > { %607 = vmatprep.mubr.bf16.mxu0 %v229_v41 }
  0x9a   : > { %608 = vmatmul.mubr.bf16.gmra.mrb[20].mxu0 %v228_v47 }
  0x9b   : > { %617 = vmatprep.mubr.bf16.mxu0 %v232_v48 }
  0xa2   : > { %618 = vmatmul.mubr.bf16.gmra.mrb[24].mxu0 %v231_v52 }
  0xa3   : > { %627 = vmatprep.mubr.bf16.mxu0 %v235_v53 }
  0xaa   : > { %628 = vmatmul.mubr.bf16.gmra.mrb[28].mxu0 %v234_v56 }
 0x128   : > { %v672_v57 = vpop.f32.mrb[0].mxu1 }
 0x129   : > { %v674_v58 = vpop.f32.mrb[1].mxu1 }
 0x12a   : > { %v676_v59 = vpop.f32.mrb[2].mxu1 }
 0x12b   : > { %v678_v60 = vpop.f32.mrb[3].mxu1 }
 0x130   : > { %v682_v61 = vpop.f32.mrb[4].mxu1 }
 0x131   : > { %v684_v62 = vpop.f32.mrb[5].mxu1 }
 0x132   : > { %v686_v63 = vpop.f32.mrb[6].mxu1 }
 0x133   : > { %v688_v1 = vpop.f32.mrb[7].mxu1 }
 0x138   : > { %v692_v2 = vpop.f32.mrb[8].mxu1 }
 0x139   : > { %v694_v3 = vpop.f32.mrb[9].mxu1 }
 0x13a   : > { %v696_v4 = vpop.f32.mrb[10].mxu1 }
 0x13b   : > { %v698_v5 = vpop.f32.mrb[11].mxu1 }
 0x140   : > { %v702_v13 = vpop.f32.mrb[12].mxu1 }
 0x141   : > { %v704_v15 = vpop.f32.mrb[13].mxu1 }
 0x142   : > { %v706_v17 = vpop.f32.mrb[14].mxu1 }
 0x143   : > { %v708_v19 = vpop.f32.mrb[15].mxu1 }
 0x145   : > { %v559_v6 = vpop.f32.mrb[0].mxu0 }
 0x146   : > { %v673_v7 = vadd.f32 %v672_v57, %v559_v6  ;;  %v561_v8 = vpop.f32.mrb[1].mxu0 }
 0x147   : > { %v675_v9 = vadd.f32 %v674_v58, %v561_v8  ;;  %v563_v10 = vpop.f32.mrb[2].mxu0 }
 0x148   : > { %v677_v11 = vadd.f32 %v676_v59, %v563_v10  ;;  %v565_v12 = vpop.f32.mrb[3].mxu0  ;;  %v712_v27 = vpop.f32.mrb[16].mxu1 }
 0x149   : > { %v679_v14 = vadd.f32 %v678_v60, %v565_v12  ;;  %v714_v29 = vpop.f32.mrb[17].mxu1 }
 0x14a   : > { %v751_v16 = vpack.c.bf16 %v677_v11, %v673_v7  ;;  %v716_v31 = vpop.f32.mrb[18].mxu1 }
 0x14b   : > { %v2098_v18 = vpack.c.bf16 %v679_v14, %v675_v9  ;;  %v718_v33 = vpop.f32.mrb[19].mxu1 }
 0x14c   : > { %775 = vrot.lane.b32.xlu0 %v751_v16, %s1790_s24  ;;  %1434 = vmatprep.mubr.msk.bf16.mxu1 %vm791_vm0, %v751_v16 }
 0x14d   : > { %v569_v20 = vpop.f32.mrb[4].mxu0  ;;  %1450 = vmatprep.subr.bf16.mxu0 %v2098_v18 }
 0x14e   : > { %v683_v21 = vadd.f32 %v682_v61, %v569_v20  ;;  %v571_v22 = vpop.f32.mrb[5].mxu0  ;;  %1451 = vmatpush3.bf16.msra.mxu0 %v2098_v18 }
 0x14f   : > { %v685_v23 = vadd.f32 %v684_v62, %v571_v22  ;;  %v573_v24 = vpop.f32.mrb[6].mxu0 }
 0x150   : > { %v687_v25 = vadd.f32 %v686_v63, %v573_v24  ;;  %v575_v26 = vpop.f32.mrb[7].mxu0  ;;  %v722_v41 = vpop.f32.mrb[20].mxu1 }
 0x151   : > { %v689_v28 = vadd.f32 %v688_v1, %v575_v26  ;;  %v724_v43 = vpop.f32.mrb[21].mxu1 }
 0x152   : > { %v2104_v30 = vpack.c.bf16 %v687_v25, %v683_v21  ;;  %v726_v45 = vpop.f32.mrb[22].mxu1 }
 0x153   : > { %v2106_v32 = vpack.c.bf16 %v689_v28, %v685_v23  ;;  %v728_v47 = vpop.f32.mrb[23].mxu1 }
 0x154   : > { %777 = vrot.lane.b32.xlu0 %v2104_v30, %s1790_s24 }
 0x155   : > { %v579_v34 = vpop.f32.mrb[8].mxu0  ;;  %1452 = vmatprep.subr.bf16.mxu0 %v2106_v32 }
 0x156   : > { %v693_v35 = vadd.f32 %v692_v2, %v579_v34  ;;  %v581_v36 = vpop.f32.mrb[9].mxu0  ;;  %1453 = vmatpush3.bf16.msra.mxu0 %v2106_v32 }
 0x157   : > { %v695_v37 = vadd.f32 %v694_v3, %v581_v36  ;;  %v583_v38 = vpop.f32.mrb[10].mxu0 }
 0x158   : > { %v697_v39 = vadd.f32 %v696_v4, %v583_v38  ;;  %v585_v40 = vpop.f32.mrb[11].mxu0  ;;  %v732_v54 = vpop.f32.mrb[24].mxu1 }
 0x159   : > { %v699_v42 = vadd.f32 %v698_v5, %v585_v40  ;;  %v734_v56 = vpop.f32.mrb[25].mxu1 }
 0x15a   : > { %v2112_v44 = vpack.c.bf16 %v697_v39, %v693_v35  ;;  %v736_v58 = vpop.f32.mrb[26].mxu1 }
 0x15b   : > { %v2114_v46 = vpack.c.bf16 %v699_v42, %v695_v37  ;;  %v738_v60 = vpop.f32.mrb[27].mxu1 }
 0x15c   : > { %779 = vrot.lane.b32.xlu1 %v2112_v44, %s1790_s24 }
 0x15d   : > { %v589_v48 = vpop.f32.mrb[12].mxu0  ;;  %1454 = vmatprep.subr.bf16.mxu0 %v2114_v46 }
 0x15e   : > { %v703_v0 = vadd.f32 %v702_v13, %v589_v48  ;;  %v591_v49 = vpop.f32.mrb[13].mxu0  ;;  %1455 = vmatpush3.bf16.msra.mxu0 %v2114_v46 }
 0x15f   : > { %v705_v50 = vadd.f32 %v704_v15, %v591_v49  ;;  %v593_v51 = vpop.f32.mrb[14].mxu0 }
 0x160   : > { %v707_v52 = vadd.f32 %v706_v17, %v593_v51  ;;  %v595_v53 = vpop.f32.mrb[15].mxu0  ;;  %v742_v5 = vpop.f32.mrb[28].mxu1 }
 0x161   : > { %v709_v55 = vadd.f32 %v708_v19, %v595_v53  ;;  %v744_v7 = vpop.f32.mrb[29].mxu1 }
 0x162   : > { %v2120_v57 = vpack.c.bf16 %v707_v52, %v703_v0  ;;  %v746_v9 = vpop.f32.mrb[30].mxu1 }
 0x163   : > { %v2122_v59 = vpack.c.bf16 %v709_v55, %v705_v50  ;;  %v748_v11 = vpop.f32.mrb[31].mxu1 }
 0x164   : > { %781 = vrot.lane.b32.xlu1 %v2120_v57, %s1790_s24 }
 0x165   : > { %v599_v61 = vpop.f32.mrb[16].mxu0  ;;  %1456 = vmatprep.subr.bf16.mxu0 %v2122_v59 }
 0x166   : > { %v713_v62 = vadd.f32 %v712_v27, %v599_v61  ;;  %v601_v63 = vpop.f32.mrb[17].mxu0  ;;  %1457 = vmatpush3.bf16.msra.mxu0 %v2122_v59 }
 0x167   : > { %v715_v1 = vadd.f32 %v714_v29, %v601_v63  ;;  %v603_v2 = vpop.f32.mrb[18].mxu0 }
 0x168   : > { %v717_v3 = vadd.f32 %v716_v31, %v603_v2  ;;  %v605_v4 = vpop.f32.mrb[19].mxu0 }
 0x169   : > { %v719_v6 = vadd.f32 %v718_v33, %v605_v4 }
 0x16a   : > { %v2128_v8 = vpack.c.bf16 %v717_v3, %v713_v62 }
 0x16b   : > { %v2130_v10 = vpack.c.bf16 %v719_v6, %v715_v1 }
 0x16c   : > { %783 = vrot.lane.b32.xlu0 %v2128_v8, %s1790_s24 }
 0x16d   : > { %v609_v12 = vpop.f32.mrb[20].mxu0  ;;  %1458 = vmatprep.subr.bf16.mxu0 %v2130_v10 }
 0x16e   : > { %v723_v13 = vadd.f32 %v722_v41, %v609_v12  ;;  %v611_v14 = vpop.f32.mrb[21].mxu0  ;;  %1459 = vmatpush3.bf16.msra.mxu0 %v2130_v10 }
 0x16f   : > { %v725_v15 = vadd.f32 %v724_v43, %v611_v14  ;;  %v613_v16 = vpop.f32.mrb[22].mxu0 }
 0x170   : > { %v727_v17 = vadd.f32 %v726_v45, %v613_v16  ;;  %v615_v19 = vpop.f32.mrb[23].mxu0 }
 0x171   : > { %v729_v20 = vadd.f32 %v728_v47, %v615_v19 }
 0x172   : > { %v2136_v21 = vpack.c.bf16 %v727_v17, %v723_v13 }
 0x173   : > { %v2138_v22 = vpack.c.bf16 %v729_v20, %v725_v15 }
 0x174   : > { %785 = vrot.lane.b32.xlu1 %v2136_v21, %s1790_s24 }
 0x175   : > { %v619_v23 = vpop.f32.mrb[24].mxu0  ;;  %1460 = vmatprep.subr.bf16.mxu0 %v2138_v22 }
 0x176   : > { %v733_v24 = vadd.f32 %v732_v54, %v619_v23  ;;  %v621_v25 = vpop.f32.mrb[25].mxu0  ;;  %1461 = vmatpush3.bf16.msra.mxu0 %v2138_v22 }
 0x177   : > { %v735_v26 = vadd.f32 %v734_v56, %v621_v25  ;;  %v623_v27 = vpop.f32.mrb[26].mxu0 }
 0x178   : > { %v737_v28 = vadd.f32 %v736_v58, %v623_v27  ;;  %v625_v29 = vpop.f32.mrb[27].mxu0 }
 0x179   : > { %v739_v31 = vadd.f32 %v738_v60, %v625_v29 }
 0x17a   : > { %v2144_v33 = vpack.c.bf16 %v737_v28, %v733_v24 }
 0x17b   : > { %v2146_v34 = vpack.c.bf16 %v739_v31, %v735_v26 }
 0x17c   : > { %787 = vrot.lane.b32.xlu0 %v2144_v33, %s1790_s24 }
 0x17d   : > { %v629_v35 = vpop.f32.mrb[28].mxu0  ;;  %1462 = vmatprep.subr.bf16.mxu0 %v2146_v34 }
 0x17e   : > { %v743_v36 = vadd.f32 %v742_v5, %v629_v35  ;;  %v631_v37 = vpop.f32.mrb[29].mxu0  ;;  %1463 = vmatpush3.bf16.msra.mxu0 %v2146_v34 }
 0x17f   : > { %v745_v38 = vadd.f32 %v744_v7, %v631_v37  ;;  %v633_v39 = vpop.f32.mrb[30].mxu0 }
 0x180   : > { %v747_v40 = vadd.f32 %v746_v9, %v633_v39  ;;  %v635_v41 = vpop.f32.mrb[31].mxu0 }
 0x181   : > { %v749_v42 = vadd.f32 %v748_v11, %v635_v41 }
 0x182   : > { %v758_v43 = vpack.c.bf16 %v747_v40, %v743_v36 }
 0x183   : > { %v766_v45 = vpack.c.bf16 %v749_v42, %v745_v38 }
 0x184   : > { %789 = vrot.lane.b32.xlu1 %v758_v43, %s1790_s24 }
 0x185   : > { %1464 = vmatprep.subr.bf16.mxu0 %v766_v45 }
 0x186   : > { %1465 = vmatpush3.bf16.msra.mxu0 %v766_v45 }
 0x1be   : > { %v776_v47 = vpop.permute.xlu0 %775 }
 0x1bf   : > { %v817_v48 = vsel %vm791_vm0, %v776_v47, 0  ;;  %1530 = vmatprep.subr.msk.bf16.mxu1 %vm791_vm0, %v776_v47 }
 0x1c0   : > { %1419 = vmatpush3.bf16.xpose.msra.mxu1 %v817_v48 }
 0x1c6   : > { %v778_v0 = vpop.permute.xlu0 %777 }
 0x1c7   : > { %v820_v49 = vsel %vm791_vm0, %v778_v0, 0  ;;  %1531 = vmatprep.subr.msk.bf16.mxu1 %vm791_vm0, %v778_v0 }
 0x1c8   : > { %1421 = vmatpush3.bf16.xpose.msra.mxu1 %v820_v49 }
 0x1ce   : > { %v780_v50 = vpop.permute.xlu1 %779 }
 0x1cf   : > { %v823_v51 = vsel %vm791_vm0, %v780_v50, 0  ;;  %1532 = vmatprep.subr.msk.bf16.mxu1 %vm791_vm0, %v780_v50 }
 0x1d0   : > { %1423 = vmatpush3.bf16.xpose.msra.mxu1 %v823_v51 }
 0x1d6   : > { %v782_v52 = vpop.permute.xlu1 %781 }
 0x1d7   : > { %v826_v53 = vsel %vm791_vm0, %v782_v52, 0  ;;  %1533 = vmatprep.subr.msk.bf16.mxu1 %vm791_vm0, %v782_v52 }
 0x1d8   : > { %1425 = vmatpush3.bf16.xpose.msra.mxu1 %v826_v53 }
 0x1de   : > { %v784_v54 = vpop.permute.xlu0 %783 }
 0x1df   : > { %v829_v55 = vsel %vm791_vm0, %v784_v54, 0  ;;  %1534 = vmatprep.subr.msk.bf16.mxu1 %vm791_vm0, %v784_v54 }
 0x1e0   : > { %1427 = vmatpush3.bf16.xpose.msra.mxu1 %v829_v55 }
 0x1e6   : > { %v786_v56 = vpop.permute.xlu1 %785 }
 0x1e7   : > { %v832_v58 = vsel %vm791_vm0, %v786_v56, 0  ;;  %1535 = vmatprep.subr.msk.bf16.mxu1 %vm791_vm0, %v786_v56 }
 0x1e8   : > { %1429 = vmatpush3.bf16.xpose.msra.mxu1 %v832_v58 }
 0x1ee   : > { %v788_v60 = vpop.permute.xlu0 %787 }
 0x1ef   : > { %v835_v61 = vsel %vm791_vm0, %v788_v60, 0  ;;  %1536 = vmatprep.subr.msk.bf16.mxu1 %vm791_vm0, %v788_v60 }
 0x1f0   : > { %1431 = vmatpush3.bf16.xpose.msra.mxu1 %v835_v61 }
 0x1f6   : > { %v790_v62 = vpop.permute.xlu1 %789 }
 0x1f7   : > { %v838_v63 = vsel %vm791_vm0, %v790_v62, 0  ;;  %1537 = vmatprep.subr.msk.bf16.mxu1 %vm791_vm0, %v790_v62 }
 0x1f8   : > { %1433 = vmatpush3.bf16.xpose.msra.mxu1 %v838_v63 }
 0x1f9   : > { %1482 = vmatprep.subr.bf16.mxu1 %v2098_v18 }
 0x1ff   : > { %1435 = vmatmul.mubr.msk.bf16.vlgmr.msra.gmra.mrb[32].mxu1 %vm791_vm0, %v2104_v30 }
 0x200   : > { %1438 = vmatprep.mubr.msk.bf16.mxu1 %vm791_vm0, %v2112_v44  ;;  %1490 = vmatpush3.bf16.msra.mxu1 %v2098_v18  ;;  %v937_v18 = vlaneseq }
 0x201   : > { %1483 = vmatprep.subr.bf16.mxu1 %v2106_v32 }
 0x202   : > { %v2196_v30 = vshrl.u32 %v937_v18, 7  ;;  %v2199_v44 = vand.u32 127, %v937_v18 }
 0x204   : > { %1491 = vmatpush3.bf16.msra.mxu1 %v2106_v32  ;;  %v940_v32 = vadd.s32 16, %v2196_v30  ;;  %vm956_vm2 = vcmp.le.s32.totalorder %v2199_v44, %v2196_v30  ;;  %v944_v5 = vadd.s32 48, %v2196_v30  ;;  %v948_v15 = vadd.s32 80, %v2196_v30 }
 0x205   : > { %1484 = vmatprep.subr.bf16.mxu1 %v2114_v46  ;;  %v946_v17 = vadd.s32 64, %v2196_v30  ;;  %v947_v28 = vadd.s32 72, %v2196_v30  ;;  %v950_v29 = vadd.s32 96, %v2196_v30  ;;  %v951_v41 = vadd.s32 104, %v2196_v30 }
 0x206   : > { %vm958_vm1 = vcmp.le.s32.totalorder %v2199_v44, %v940_v32  ;;  %vm962_vm5 = vcmp.le.s32.totalorder %v2199_v44, %v944_v5  ;;  %vm966_vm8 = vcmp.le.s32.totalorder %v2199_v44, %v948_v15 }
 0x207   : > { %1439 = vmatmul.mubr.msk.bf16.gmra.mrb[36].mxu1 %vm791_vm0, %v2120_v57  ;;  %v941_v57 = vadd.s32 24, %v2196_v30  ;;  %vm964_vm9 = vcmp.le.s32.totalorder %v2199_v44, %v946_v17  ;;  %vm965_vm11 = vcmp.le.s32.totalorder %v2199_v44, %v947_v28  ;;  %vm968_vm12 = vcmp.le.s32.totalorder %v2199_v44, %v950_v29 }
 0x208   : > { %1442 = vmatprep.mubr.msk.bf16.mxu1 %vm791_vm0, %v2128_v8  ;;  %1492 = vmatpush3.bf16.msra.mxu1 %v2114_v46  ;;  %v939_v46 = vadd.s32 8, %v2196_v30  ;;  %v943_v8 = vadd.s32 40, %v2196_v30  ;;  %vm969_vm15 = vcmp.le.s32.totalorder %v2199_v44, %v951_v41 }
 0x209   : > { %1485 = vmatprep.subr.bf16.mxu1 %v2122_v59  ;;  %vm959_vm4 = vcmp.le.s32.totalorder %v2199_v44, %v941_v57 }
 0x20a   : > { %vm957_vm3 = vcmp.le.s32.totalorder %v2199_v44, %v939_v46  ;;  %vm961_vm6 = vcmp.le.s32.totalorder %v2199_v44, %v943_v8 }
 0x20c   : > { %1493 = vmatpush3.bf16.msra.mxu1 %v2122_v59 }
 0x20d   : > { %1486 = vmatprep.subr.bf16.mxu1 %v2130_v10 }
 0x20f   : > { %1443 = vmatmul.mubr.msk.bf16.gmra.mrb[40].mxu1 %vm791_vm0, %v2136_v21  ;;  %v949_v21 = vadd.s32 88, %v2196_v30 }
 0x210   : > { %1446 = vmatprep.mubr.msk.bf16.mxu1 %vm791_vm0, %v2144_v33  ;;  %1494 = vmatpush3.bf16.msra.mxu1 %v2130_v10  ;;  %v942_v10 = vadd.s32 32, %v2196_v30  ;;  %v945_v33 = vadd.s32 56, %v2196_v30 }
 0x211   : > { %1487 = vmatprep.subr.bf16.mxu1 %v2138_v22  ;;  %vm967_vm10 = vcmp.le.s32.totalorder %v2199_v44, %v949_v21 }
 0x212   : > { %vm960_vm7 = vcmp.le.s32.totalorder %v2199_v44, %v942_v10  ;;  %vm963_vm13 = vcmp.le.s32.totalorder %v2199_v44, %v945_v33 }
 0x214   : > { %1495 = vmatpush3.bf16.msra.mxu1 %v2138_v22 }
 0x215   : > { %1488 = vmatprep.subr.bf16.mxu1 %v2146_v34 }
 0x217   : > { %1447 = vmatmul.mubr.msk.bf16.gmra.mrb[44].mxu1 %vm791_vm0, %v758_v43 }
 0x218   : > { %1496 = vmatpush3.bf16.msra.mxu1 %v2146_v34  ;;  %v952_v34 = vadd.s32 112, %v2196_v30 }
 0x219   : > { %1489 = vmatprep.subr.bf16.mxu1 %v766_v45 }
 0x21a   : > { %vm970_vm14 = vcmp.le.s32.totalorder %v2199_v44, %v952_v34 }
 0x21c   : > { %1497 = vmatpush3.bf16.msra.mxu1 %v766_v45  ;;  %v953_v45 = vadd.s32 120, %v2196_v30 }
 0x2d2   : > { %v1436_v59 = vpop.f32.mrb[32].mxu1 }
 0x2d3   : > { %v874_v1 = vpop.f32.mrb[33].mxu1  ;;  %v2206_v2 = vsel %vm958_vm1, %v1436_v59, -inf  ;;  %vm971_vm1 = vcmp.le.s32.totalorder %v2199_v44, %v953_v45 }
 0x2d4   : > { %992 = vmax.xlane.f32.xlu1 %v2206_v2  ;;  %v1437_v3 = vpop.f32.mrb[34].mxu1  ;;  %v2210_v4 = vsel %vm956_vm2, %v874_v1, -inf }
 0x2d5   : > { %988 = vmax.xlane.f32.xlu0 %v2210_v4  ;;  %v877_v6 = vpop.f32.mrb[35].mxu1  ;;  %v2219_v9 = vsel %vm959_vm4, %v1437_v3, -inf }
 0x2d6   : > { %v2215_v7 = vsel %vm957_vm3, %v877_v6, -inf }
 0x2d8   : > { %990 = vmax.xlane.f32.xlu1 %v2215_v7 }
 0x2d9   : > { %994 = vmax.xlane.f32.xlu0 %v2219_v9 }
 0x2da   : > { %v1440_v11 = vpop.f32.mrb[36].mxu1 }
 0x2db   : > { %v890_v12 = vpop.f32.mrb[37].mxu1  ;;  %v2224_v13 = vsel %vm962_vm5, %v1440_v11, -inf }
 0x2dc   : > { %1000 = vmax.xlane.f32.xlu1 %v2224_v13  ;;  %v1441_v14 = vpop.f32.mrb[38].mxu1  ;;  %v2234_v20 = vsel %vm960_vm7, %v890_v12, -inf }
 0x2dd   : > { %v893_v16 = vpop.f32.mrb[39].mxu1  ;;  %v2265_v42 = vsel %vm963_vm13, %v1441_v14, -inf }
 0x2de   : > { %v2231_v19 = vsel %vm961_vm6, %v893_v16, -inf }
 0x2df   : > { %998 = vmax.xlane.f32.xlu0 %v2231_v19 }
 0x2e0   : > { %996 = vmax.xlane.f32.xlu1 %v2234_v20 }
 0x2e2   : > { %v1444_v22 = vpop.f32.mrb[40].mxu1 }
 0x2e3   : > { %v906_v23 = vpop.f32.mrb[41].mxu1  ;;  %v2240_v24 = vsel %vm966_vm8, %v1444_v22, -inf }
 0x2e4   : > { %1008 = vmax.xlane.f32.xlu1 %v2240_v24  ;;  %v1445_v25 = vpop.f32.mrb[42].mxu1  ;;  %v2243_v26 = vsel %vm964_vm9, %v906_v23, -inf }
 0x2e5   : > { %1004 = vmax.xlane.f32.xlu0 %v2243_v26  ;;  %v909_v27 = vpop.f32.mrb[43].mxu1  ;;  %v2249_v31 = vsel %vm967_vm10, %v1445_v25, -inf }
 0x2e6   : > { %v2256_v38 = vsel %vm965_vm11, %v909_v27, -inf }
 0x2e9   : > { %1010 = vmax.xlane.f32.xlu0 %v2249_v31 }
 0x2ea   : > { %v1448_v35 = vpop.f32.mrb[44].mxu1 }
 0x2eb   : > { %v922_v36 = vpop.f32.mrb[45].mxu1  ;;  %v2267_v43 = vsel %vm970_vm14, %v1448_v35, -inf }
 0x2ec   : > { %v1449_v37 = vpop.f32.mrb[46].mxu1  ;;  %v2258_v39 = vsel %vm968_vm12, %v922_v36, -inf }
 0x2ed   : > { %1006 = vmax.xlane.f32.xlu0 %v2256_v38  ;;  %1012 = vmax.xlane.f32.xlu1 %v2258_v39  ;;  %v925_v40 = vpop.f32.mrb[47].mxu1  ;;  %v2277_v48 = vsel %vm971_vm1, %v1449_v37, -inf }
 0x2ee   : > { %v2273_v47 = vsel %vm969_vm15, %v925_v40, -inf }
 0x2f1   : > { %1002 = vmax.xlane.f32.xlu0 %v2265_v42  ;;  %1016 = vmax.xlane.f32.xlu1 %v2267_v43 }
 0x2f5   : > { %1014 = vmax.xlane.f32.xlu0 %v2273_v47 }
 0x2f9   : > { %1018 = vmax.xlane.f32.xlu0 %v2277_v48 }
 0x361   : > { %v993_v0 = vpop.xlane.xlu1 %992 }
 0x362   : > { %v1022_v49 = vsub.f32 %v2206_v2, %v993_v0  ;;  %v989_v50 = vpop.xlane.xlu0 %988 }
 0x363   : > { %v1020_v51 = vsub.f32 %v2210_v4, %v989_v50 }
 0x364   : > { %v1040_v52 = vmul.f32 1.442695, %v1022_v49 }
 0x365   : > { %v991_v53 = vpop.xlane.xlu1 %990  ;;  %v1036_v54 = vmul.f32 1.442695, %v1020_v51 }
 0x366   : > { %1656 = vpow2.f32 %v1040_v52  ;;  %v995_v55 = vpop.xlane.xlu0 %994  ;;  %v1021_v56 = vsub.f32 %v2215_v7, %v991_v53 }
 0x367   : > { %v1023_v58 = vsub.f32 %v2219_v9, %v995_v55  ;;  %1658 = vpow2.f32 %v1036_v54 }
 0x368   : > { %v1038_v62 = vmul.f32 1.442695, %v1021_v56 }
 0x369   : > { %v1042_v60 = vmul.f32 1.442695, %v1023_v58  ;;  %v1001_v61 = vpop.xlane.xlu1 %1000 }
 0x36a   : > { %v1026_v7 = vsub.f32 %v2224_v13, %v1001_v61 }
 0x36b   : > { %1660 = vpow2.f32 %v1042_v60 }
 0x36c   : > { %v999_v63 = vpop.xlane.xlu0 %998  ;;  %1662 = vpow2.f32 %v1038_v62  ;;  %v1048_v14 = vmul.f32 1.442695, %v1026_v7 }
 0x36d   : > { %v1025_v18 = vsub.f32 %v2231_v19, %v999_v63  ;;  %v997_v30 = vpop.xlane.xlu1 %996 }
 0x36e   : > { %v1024_v32 = vsub.f32 %v2234_v20, %v997_v30 }
 0x36f   : > { %v1046_v44 = vmul.f32 1.442695, %v1025_v18 }
 0x370   : > { %v2286_v46 = vpop.eup %1656  ;;  %v1044_v57 = vmul.f32 1.442695, %v1024_v32 }
 0x371   : > { %v1009_v59 = vpop.xlane.xlu1 %1008  ;;  %1072 = vadd.xlane.f32.xlu1 %v2286_v46  ;;  %v2291_v4 = vpop.eup %1658 }
 0x372   : > { %1664 = vpow2.f32 %v1044_v57  ;;  %v1030_v1 = vsub.f32 %v2240_v24, %v1009_v59  ;;  %v1005_v2 = vpop.xlane.xlu0 %1004 }
 0x373   : > { %1666 = vpow2.f32 %v1046_v44  ;;  %v1028_v3 = vsub.f32 %v2243_v26, %v1005_v2 }
 0x374   : > { %v1056_v5 = vmul.f32 1.442695, %v1030_v1 }
 0x375   : > { %v2293_v6 = vpop.eup %1660  ;;  %1068 = vadd.xlane.f32.xlu1 %v2291_v4  ;;  %v1052_v8 = vmul.f32 1.442695, %v1028_v3 }
 0x376   : > { %1668 = vpow2.f32 %v1056_v5  ;;  %v1011_v9 = vpop.xlane.xlu0 %1010  ;;  %1074 = vadd.xlane.f32.xlu0 %v2293_v6  ;;  %v2299_v11 = vpop.eup %1662 }
 0x377   : > { %v1031_v10 = vsub.f32 %v2249_v31, %v1011_v9  ;;  %1670 = vpow2.f32 %v1052_v8 }
 0x379   : > { %v1058_v12 = vmul.f32 1.442695, %v1031_v10 }
 0x37a   : > { %v1007_v15 = vpop.xlane.xlu0 %1006  ;;  %v1013_v16 = vpop.xlane.xlu1 %1012  ;;  %1070 = vadd.xlane.f32.xlu0 %v2299_v11 }
 0x37b   : > { %1672 = vpow2.f32 %v1058_v12  ;;  %v1029_v17 = vsub.f32 %v2256_v38, %v1007_v15  ;;  %v1032_v13 = vsub.f32 %v2258_v39, %v1013_v16 }
 0x37c   : > { %v2304_v19 = vpop.eup %1664  ;;  %1674 = vpow2.f32 %v1048_v14 }
 0x37d   : > { %v2306_v20 = vpop.eup %1666  ;;  %v1054_v21 = vmul.f32 1.442695, %v1029_v17  ;;  %1076 = vadd.xlane.f32.xlu1 %v2304_v19  ;;  %v1060_v22 = vmul.f32 1.442695, %v1032_v13 }
 0x37e   : > { %v1003_v23 = vpop.xlane.xlu0 %1002  ;;  %v1017_v24 = vpop.xlane.xlu1 %1016  ;;  %1078 = vadd.xlane.f32.xlu0 %v2306_v20 }
 0x37f   : > { %1676 = vpow2.f32 %v1054_v21  ;;  %v1027_v25 = vsub.f32 %v2265_v42, %v1003_v23  ;;  %v1034_v26 = vsub.f32 %v2267_v43, %v1017_v24 }
 0x380   : > { %v2312_v27 = vpop.eup %1668  ;;  %1678 = vpow2.f32 %v1060_v22 }
 0x381   : > { %v1050_v28 = vmul.f32 1.442695, %v1027_v25  ;;  %1088 = vadd.xlane.f32.xlu1 %v2312_v27  ;;  %v1064_v29 = vmul.f32 1.442695, %v1034_v26  ;;  %v2316_v34 = vpop.eup %1670 }
 0x382   : > { %v1015_v31 = vpop.xlane.xlu0 %1014 }
 0x383   : > { %1680 = vpow2.f32 %v1050_v28  ;;  %v1033_v33 = vsub.f32 %v2273_v47, %v1015_v31 }
 0x384   : > { %1682 = vpow2.f32 %v1064_v29 }
 0x385   : > { %v2318_v35 = vpop.eup %1672  ;;  %v1062_v36 = vmul.f32 1.442695, %v1033_v33  ;;  %1084 = vadd.xlane.f32.xlu1 %v2316_v34 }
 0x386   : > { %1090 = vadd.xlane.f32.xlu0 %v2318_v35  ;;  %v1019_v37 = vpop.xlane.xlu0 %1018  ;;  %v2323_v39 = vpop.eup %1674 }
 0x387   : > { %1684 = vpow2.f32 %v1062_v36  ;;  %v1035_v38 = vsub.f32 %v2277_v48, %v1019_v37 }
 0x389   : > { %v2325_v40 = vpop.eup %1676  ;;  %v1066_v41 = vmul.f32 1.442695, %v1035_v38  ;;  %1080 = vadd.xlane.f32.xlu1 %v2323_v39 }
 0x38a   : > { %1086 = vadd.xlane.f32.xlu0 %v2325_v40  ;;  %v2329_v42 = vpop.eup %1678 }
 0x38b   : > { %1686 = vpow2.f32 %v1066_v41 }
 0x38d   : > { %v2331_v43 = vpop.eup %1680  ;;  %1092 = vadd.xlane.f32.xlu1 %v2329_v42 }
 0x38e   : > { %1082 = vadd.xlane.f32.xlu0 %v2331_v43  ;;  %v2335_v45 = vpop.eup %1682 }
 0x391   : > { %v2337_v47 = vpop.eup %1684  ;;  %1096 = vadd.xlane.f32.xlu1 %v2335_v45 }
 0x392   : > { %1094 = vadd.xlane.f32.xlu0 %v2337_v47 }
 0x395   : > { %v2341_v48 = vpop.eup %1686 }
 0x396   : > { %1098 = vadd.xlane.f32.xlu0 %v2341_v48 }
 0x3fe   : > { %v1073_v0 = vpop.xlane.xlu1 %1072 }
 0x402   : > { %v1069_v49 = vpop.xlane.xlu1 %1068 }
 0x403   : > { %v1075_v50 = vpop.xlane.xlu0 %1074 }
 0x404   : > { %1688 = vrcp.f32 %v1075_v50 }
 0x405   : > { %1690 = vrcp.f32 %v1069_v49 }
 0x406   : > { %1692 = vrcp.f32 %v1073_v0 }
 0x407   : > { %v1071_v51 = vpop.xlane.xlu0 %1070 }
 0x408   : > { %1694 = vrcp.f32 %v1071_v51 }
 0x40a   : > { %v1077_v52 = vpop.xlane.xlu1 %1076 }
 0x40b   : > { %1696 = vrcp.f32 %v1077_v52  ;;  %v1079_v53 = vpop.xlane.xlu0 %1078 }
 0x40c   : > { %1698 = vrcp.f32 %v1079_v53 }
 0x40e   : > { %v1089_v54 = vpop.xlane.xlu1 %1088  ;;  %v1689_v55 = vpop.eup %1688 }
 0x40f   : > { %v1691_v56 = vpop.eup %1690  ;;  %v1119_v61 = vmul.f32 %v1689_v55, %v2293_v6 }
 0x410   : > { %v1693_v58 = vpop.eup %1692  ;;  %v1116_v18 = vmul.f32 %v1691_v56, %v2291_v4 }
 0x411   : > { %v1118_v32 = vmul.f32 %v1693_v58, %v2286_v46 }
 0x412   : > { %v1695_v60 = vpop.eup %1694  ;;  %v1085_v62 = vpop.xlane.xlu1 %1084 }
 0x413   : > { %v1091_v63 = vpop.xlane.xlu0 %1090  ;;  %v1117_v30 = vmul.f32 %v1695_v60, %v2299_v11  ;;  %v1133_v2 = vpack.c.bf16 %v1119_v61, %v1118_v32 }
 0x414   : > { %1700 = vrcp.f32 %v1091_v63 }
 0x415   : > { %v1697_v44 = vpop.eup %1696  ;;  %v1132_v57 = vpack.c.bf16 %v1117_v30, %v1116_v18  ;;  %1702 = vrcp.f32 %v1085_v62 }
 0x416   : > { %v1699_v59 = vpop.eup %1698  ;;  %v1081_v1 = vpop.xlane.xlu1 %1080  ;;  %v1120_v3 = vmul.f32 %v1697_v44, %v2304_v19  ;;  %1704 = vrcp.f32 %v1089_v54 }
 0x417   : > { %1466 = vmatprep.mubr.bf16.mxu0 %v1132_v57  ;;  %v1087_v5 = vpop.xlane.xlu0 %1086  ;;  %v1121_v6 = vmul.f32 %v1699_v59, %v2306_v20 }
 0x418   : > { %1706 = vrcp.f32 %v1087_v5  ;;  %1467 = vmatmul.mubr.bf16.vlgmr.msra.gmra.mrb[32].mxu0 %v1133_v2 }
 0x419   : > { %v1134_v4 = vpack.c.bf16 %v1121_v6, %v1120_v3  ;;  %1708 = vrcp.f32 %v1081_v1 }
 0x41a   : > { %v1093_v7 = vpop.xlane.xlu1 %1092 }
 0x41b   : > { %v1083_v46 = vpop.xlane.xlu0 %1082  ;;  %1470 = vmatprep.mubr.bf16.mxu0 %v1134_v4 }
 0x41c   : > { %1710 = vrcp.f32 %v1083_v46 }
 0x41d   : > { %1712 = vrcp.f32 %v1093_v7 }
 0x41e   : > { %v1701_v8 = vpop.eup %1700  ;;  %v1097_v9 = vpop.xlane.xlu1 %1096 }
 0x41f   : > { %v1095_v10 = vpop.xlane.xlu0 %1094  ;;  %v1703_v11 = vpop.eup %1702  ;;  %v1127_v15 = vmul.f32 %v1701_v8, %v2318_v35 }
 0x420   : > { %1714 = vrcp.f32 %v1095_v10  ;;  %v1705_v12 = vpop.eup %1704  ;;  %v1124_v17 = vmul.f32 %v1703_v11, %v2316_v34 }
 0x421   : > { %1716 = vrcp.f32 %v1097_v9  ;;  %v1126_v20 = vmul.f32 %v1705_v12, %v2312_v27 }
 0x422   : > { %v1707_v14 = vpop.eup %1706 }
 0x423   : > { %v1099_v16 = vpop.xlane.xlu0 %1098  ;;  %v1125_v13 = vmul.f32 %v1707_v14, %v2325_v40  ;;  %v1709_v19 = vpop.eup %1708  ;;  %v1137_v23 = vpack.c.bf16 %v1127_v15, %v1126_v20 }
 0x424   : > { %1718 = vrcp.f32 %v1099_v16  ;;  %v1122_v24 = vmul.f32 %v1709_v19, %v2323_v39 }
 0x425   : > { %v1136_v21 = vpack.c.bf16 %v1125_v13, %v1124_v17 }
 0x426   : > { %v1711_v22 = vpop.eup %1710 }
 0x427   : > { %1474 = vmatprep.mubr.bf16.mxu1 %v1136_v21  ;;  %v1123_v25 = vmul.f32 %v1711_v22, %v2331_v43  ;;  %v1713_v26 = vpop.eup %1712 }
 0x428   : > { %1475 = vmatmul.mubr.bf16.vlgmr.msra.gmra.mrb[48].mxu1 %v1137_v23  ;;  %v1128_v31 = vmul.f32 %v1713_v26, %v2329_v42 }
 0x429   : > { %v1135_v28 = vpack.c.bf16 %v1123_v25, %v1122_v24 }
 0x42a   : > { %v1715_v29 = vpop.eup %1714 }
 0x42b   : > { %1471 = vmatmul.mubr.bf16.gmra.mrb[36].mxu0 %v1135_v28  ;;  %v1129_v27 = vmul.f32 %v1715_v29, %v2337_v47  ;;  %v1717_v33 = vpop.eup %1716 }
 0x42c   : > { %v1130_v36 = vmul.f32 %v1717_v33, %v2335_v45 }
 0x42d   : > { %v1138_v34 = vpack.c.bf16 %v1129_v27, %v1128_v31 }
 0x42e   : > { %v1719_v35 = vpop.eup %1718 }
 0x42f   : > { %1478 = vmatprep.mubr.bf16.mxu1 %v1138_v34  ;;  %v1131_v37 = vmul.f32 %v1719_v35, %v2341_v48 }
 0x431   : > { %v1139_v38 = vpack.c.bf16 %v1131_v37, %v1130_v36 }
 0x433   : > { %1479 = vmatmul.mubr.bf16.gmra.mrb[52].mxu1 %v1139_v38 }
 0x4eb   : > { %v1468_v39 = vpop.f32.mrb[32].mxu0 }
 0x4ec   : > { %1239 = vst.msk [vmem:[%s2365_s5 + $0x10] sm:$0xff] %vm791_vm0, %v1468_v39  ;;  %v1174_v40 = vpop.f32.mrb[33].mxu0 }
 0x4ed   : > { %1237 = vst.msk [vmem:[%s2365_s5] sm:$0xff] %vm791_vm0, %v1174_v40  ;;  %v1469_v41 = vpop.f32.mrb[34].mxu0 }
 0x4ee   : > { %1240 = vst.msk [vmem:[%s2365_s5 + $0x18] sm:$0xff] %vm791_vm0, %v1469_v41  ;;  %v1177_v42 = vpop.f32.mrb[35].mxu0 }
 0x4ef   : > { %1238 = vst.msk [vmem:[%s2365_s5 + $0x8] sm:$0xff] %vm791_vm0, %v1177_v42 }
 0x4fb   : > { %v1476_v43 = vpop.f32.mrb[48].mxu1 }
 0x4fc   : > { %1247 = vst.msk [vmem:[%s2365_s5 + $0x50] sm:$0xff] %vm791_vm0, %v1476_v43  ;;  %v1206_v45 = vpop.f32.mrb[49].mxu1 }
 0x4fd   : > { %1245 = vst.msk [vmem:[%s2365_s5 + $0x40] sm:$0xff] %vm791_vm0, %v1206_v45  ;;  %v1477_v47 = vpop.f32.mrb[50].mxu1 }
 0x4fe   : > { %1248 = vst.msk [vmem:[%s2365_s5 + $0x58] sm:$0xff] %vm791_vm0, %v1477_v47  ;;  %v1472_v48 = vpop.f32.mrb[36].mxu0  ;;  %v1209_v0 = vpop.f32.mrb[51].mxu1 }
 0x4ff   : > { %1243 = vst.msk [vmem:[%s2365_s5 + $0x30] sm:$0xff] %vm791_vm0, %v1472_v48  ;;  %1246 = vst.msk [vmem:[%s2365_s5 + $0x48] sm:$0xff] %vm791_vm0, %v1209_v0  ;;  %v1190_v49 = vpop.f32.mrb[37].mxu0 }
 0x500   : > { %1241 = vst.msk [vmem:[%s2365_s5 + $0x20] sm:$0xff] %vm791_vm0, %v1190_v49  ;;  %v1473_v50 = vpop.f32.mrb[38].mxu0 }
 0x501   : > { %1244 = vst.msk [vmem:[%s2365_s5 + $0x38] sm:$0xff] %vm791_vm0, %v1473_v50  ;;  %v1193_v51 = vpop.f32.mrb[39].mxu0 }
 0x502   : > { %1242 = vst.msk [vmem:[%s2365_s5 + $0x28] sm:$0xff] %vm791_vm0, %v1193_v51 }
 0x506   : > { %v1480_v52 = vpop.f32.mrb[52].mxu1 }
 0x507   : > { %1251 = vst.msk [vmem:[%s2365_s5 + $0x70] sm:$0xff] %vm791_vm0, %v1480_v52  ;;  %v1222_v53 = vpop.f32.mrb[53].mxu1 }
 0x508   : > { %1249 = vst.msk [vmem:[%s2365_s5 + $0x60] sm:$0xff] %vm791_vm0, %v1222_v53  ;;  %v1481_v54 = vpop.f32.mrb[54].mxu1 }
 0x509   : > { %1252 = vst.msk [vmem:[%s2365_s5 + $0x78] sm:$0xff] %vm791_vm0, %v1481_v54  ;;  %v1225_v55 = vpop.f32.mrb[55].mxu1 }
 0x50a   : > { %1250 = vst.msk [vmem:[%s2365_s5 + $0x68] sm:$0xff] %vm791_vm0, %v1225_v55 }
 0x50b PF: > { %p12_p8 = scmp.ge.s32.totalorder %s1828_s14, 4   ;;  %s2418_s9 = smov %s1776_s10 }
 0x50c   : > { %s2419_s10 = smov %s1780_s11  ;;  %s2420_s11 = smov %s1838_s17 }
 0x50d   : > { %s2421_s12 = smov %s1828_s14  ;;  %14 = sbr.rel (!%p12_p8) target bundleno = 3 (0x3), region = 68 }
 0x514   :  { %1274 = vsyncpa [#allocation3], 1 }
 0x515   :  { %1276 = vsyncpa [#allocation3 + $0x1], 1 }

</bundles_post_ra>
